<compile_context>
chip_gen: v6e
topology: v6e:2x2x1
jax: 0.10.0
libtpu: 0.0.40
codegen_flags: <defaults>
</compile_context>

<pallas_src>
import math

import jax
import jax.numpy as jnp
from jax.experimental import pallas as pl
from jax.experimental.pallas import tpu as pltpu


# ---------------------------------------------------------------------------
# Pallas kernel: tiled (patches @ weight) with f32 VMEM accumulator + bias.
# ---------------------------------------------------------------------------
def conv_mm_kernel(p_ref, w_ref, b_ref, o_ref, acc_ref):
    kstep = pl.program_id(2)

    @pl.when(kstep == 0)
    def _():
        acc_ref[...] = jnp.zeros_like(acc_ref)

    acc_ref[...] += jnp.dot(
        p_ref[...], w_ref[...], preferred_element_type=jnp.float32)

    @pl.when(kstep == pl.num_programs(2) - 1)
    def _():
        # Bias add once per output tile, in f32, then store (lane-dense tile).
        o_ref[...] = (acc_ref[...] + b_ref[...]).astype(o_ref.dtype)


# ---------------------------------------------------------------------------
# Layout glue (no FLOPs): nearest upsample + im2col, done in plain JAX.
# ---------------------------------------------------------------------------
def _round_up(x, m):
    return (x + m - 1) // m * m


def _nearest_upsample(x, scale_factor):
    """F.interpolate(mode='nearest') semantics for NCHW input."""
    B, C, H, W = x.shape
    Ho = int(math.floor(H * scale_factor))
    Wo = int(math.floor(W * scale_factor))
    rows = jnp.floor(jnp.arange(Ho) * (H / Ho)).astype(jnp.int32)
    cols = jnp.floor(jnp.arange(Wo) * (W / Wo)).astype(jnp.int32)
    return x[:, :, rows[:, None], cols[None, :]]


def _im2col(x_nhwc, kernel_size, padding):
    """x_nhwc [B,H,W,C] -> patches [B*Ho*Wo, k*k*C] in (kh, kw, c) order."""
    B, H, W, C = x_nhwc.shape
    Ho = H + 2 * padding - kernel_size + 1
    Wo = W + 2 * padding - kernel_size + 1
    xp = jnp.pad(x_nhwc, ((0, 0), (padding, padding), (padding, padding), (0, 0)))
    cols = []
    for kh in range(kernel_size):
        for kw in range(kernel_size):
            cols.append(xp[:, kh:kh + Ho, kw:kw + Wo, :])
    patches = jnp.concatenate(cols, axis=-1)               # [B, Ho, Wo, k*k*C]
    return patches.reshape(B * Ho * Wo, kernel_size * kernel_size * C), Ho, Wo


# ---------------------------------------------------------------------------
# Forward pass
# ---------------------------------------------------------------------------
def resize_conv2d_forward(x, weight, bias, scale_factor, *, padding=1,
                          compute_dtype=jnp.bfloat16, tm=128, tn=128, tk=128):
    """ResizeConv2d.forward: nearest upsample then Conv2d(stride=1, padding=1)."""
    B, Cin, _, _ = x.shape
    Cout, _, kH, kW = weight.shape
    assert kH == kW, "square kernels only"
    ksz = kH

    x = x.astype(jnp.float32)
    x_up = _nearest_upsample(x, scale_factor)               # [B, Cin, Hu, Wu]
    x_nhwc = jnp.transpose(x_up, (0, 2, 3, 1))              # [B, Hu, Wu, Cin]
    patches, Ho, Wo = _im2col(x_nhwc, ksz, padding)         # [M, K]
    M, K = patches.shape

    # weight [Cout, Cin, kh, kw] -> [kh, kw, Cin, Cout] -> [K, Cout]
    w_mat = jnp.transpose(weight.astype(jnp.float32), (2, 3, 1, 0)).reshape(K, Cout)
    b_row = bias.astype(jnp.float32).reshape(1, Cout)

    # Lane/sublane-friendly padding: lane-dense output (Cout -> mult of 128),
    # full MXU K dimension, row tiles divisible by tm. Zero padding is exact.
    Mp, Kp, Np = _round_up(M, tm), _round_up(K, tk), _round_up(Cout, tn)
    p_pad = jnp.pad(patches, ((0, Mp - M), (0, Kp - K)))
    w_pad = jnp.pad(w_mat, ((0, Kp - K), (0, Np - Cout)))
    b_pad = jnp.pad(b_row, ((0, 0), (0, Np - Cout)))

    # bf16 MXU inputs, f32 accumulation; bias/output elementwise stays f32.
    p_c = p_pad.astype(compute_dtype)
    w_c = w_pad.astype(compute_dtype)

    grid = (Mp // tm, Np // tn, Kp // tk)
    bytes_accessed = (p_c.size * p_c.dtype.itemsize
                      + w_c.size * w_c.dtype.itemsize
                      + b_pad.size * 4 + Mp * Np * 4)

    out = pl.pallas_call(
        conv_mm_kernel,
        out_shape=jax.ShapeDtypeStruct((Mp, Np), jnp.float32),
        grid_spec=pltpu.PrefetchScalarGridSpec(
            num_scalar_prefetch=0,
            grid=grid,
            in_specs=[
                pl.BlockSpec((tm, tk), lambda i, j, kk: (i, kk)),   # patches
                pl.BlockSpec((tk, tn), lambda i, j, kk: (kk, j)),   # weight
                pl.BlockSpec((1, tn), lambda i, j, kk: (0, j)),     # bias
            ],
            out_specs=pl.BlockSpec((tm, tn), lambda i, j, kk: (i, j)),
            scratch_shapes=[pltpu.VMEM((tm, tn), jnp.float32)],
        ),
        compiler_params=pltpu.CompilerParams(
            dimension_semantics=("parallel", "parallel", "arbitrary"),
            vmem_limit_bytes=32 * 1024 * 1024,
        ),
        cost_estimate=pl.CostEstimate(
            flops=2 * Mp * Kp * Np,
            transcendentals=0,
            bytes_accessed=bytes_accessed),
    )(p_c, w_c, b_pad)

    out = out[:M, :Cout]                                    # strip padding
    out = out.reshape(B, Ho, Wo, Cout)
    return jnp.transpose(out, (0, 3, 1, 2))                 # back to NCHW


# ---------------------------------------------------------------------------
# References
# ---------------------------------------------------------------------------
def reference_quantized(x, weight, bias, scale_factor, padding=1,
                        compute_dtype=jnp.bfloat16):
    """Pure-JAX reference with the same bf16 operand quantization as the MXU path."""
    B, Cin, _, _ = x.shape
    Cout, _, ksz, _ = weight.shape
    x_up = _nearest_upsample(x.astype(jnp.float32), scale_factor)
    x_nhwc = jnp.transpose(x_up, (0, 2, 3, 1))
    patches, Ho, Wo = _im2col(x_nhwc, ksz, padding)
    w_mat = jnp.transpose(weight.astype(jnp.float32), (2, 3, 1, 0)).reshape(-1, Cout)
    p_q = patches.astype(compute_dtype).astype(jnp.float32)
    w_q = w_mat.astype(compute_dtype).astype(jnp.float32)
    out = jnp.dot(p_q, w_q, precision=jax.lax.Precision.HIGHEST) + bias.reshape(1, Cout)
    out = out.reshape(B, Ho, Wo, Cout)
    return jnp.transpose(out, (0, 3, 1, 2))


def reference_conv_f32(x, weight, bias, scale_factor, padding=1):
    """Independent full-f32 reference: nearest upsample + lax.conv."""
    x_up = _nearest_upsample(x.astype(jnp.float32), scale_factor)
    out = jax.lax.conv_general_dilated(
        x_up, weight.astype(jnp.float32),
        window_strides=(1, 1),
        padding=((padding, padding), (padding, padding)),
        dimension_numbers=("NCHW", "OIHW", "NCHW"),
        precision=jax.lax.Precision.HIGHEST)
    return out + bias.reshape(1, -1, 1, 1)


if __name__ == "__main__":
    key = jax.random.PRNGKey(0)
    kx, kw, kb = jax.random.split(key, 3)

    # Small shapes consistent with the module: batch=2, channels=4->8,
    # spatial 8x8 upsampled x2 to 16x16, kernel_size=3, padding=1.
    B, Cin, H, W = 2, 4, 8, 8
    Cout, ksize, scale = 8, 3, 2

    x = jax.random.normal(kx, (B, Cin, H, W), dtype=jnp.float32)
    fan_in = Cin * ksize * ksize
    bound = 1.0 / math.sqrt(fan_in)   # nn.Conv2d default init range
    weight = jax.random.uniform(kw, (Cout, Cin, ksize, ksize), jnp.float32,
                                -bound, bound)
    bias = jax.random.uniform(kb, (Cout,), jnp.float32, -bound, bound)

    out = resize_conv2d_forward(x, weight, bias, scale)
    out = jax.block_until_ready(out)

    assert out.shape == (B, Cout, H * scale, W * scale), out.shape

    # Tight check vs. a reference using the same bf16 operand quantization.
    ref_q = reference_quantized(x, weight, bias, scale)
    assert jnp.allclose(out, ref_q, atol=1e-4, rtol=1e-4), \
        float(jnp.max(jnp.abs(out - ref_q)))

    # Looser check vs. an independent full-f32 upsample+conv reference
    # (validates the upsample / im2col plumbing end-to-end).
    ref_f32 = reference_conv_f32(x, weight, bias, scale)
    assert jnp.allclose(out, ref_f32, atol=2e-2, rtol=2e-2), \
        float(jnp.max(jnp.abs(out - ref_f32)))

    # TODO(synk): for very large images, the im2col patch matrix (k*k*Cin
    # blow-up) should be built per row-tile inside the kernel via manual DMA
    # of shifted input rows instead of being materialized in HBM.
    print("KERNEL_OK")
</pallas_src>

<mosaic_0001>
module attributes {stable_mosaic.version = 11 : i64} {
  func.func @conv_mm_kernel(%arg0: i32, %arg1: i32, %arg2: i32, %arg3: memref<128x128xbf16, #tpu.memory_space<vmem>>, %arg4: memref<128x128xbf16, #tpu.memory_space<vmem>>, %arg5: memref<1x128xf32, #tpu.memory_space<vmem>>, %arg6: memref<128x128xf32, #tpu.memory_space<vmem>>, %arg7: memref<128x128xf32, #tpu.memory_space<vmem>>) attributes {dimension_semantics = [#tpu.dimension_semantics<parallel>, #tpu.dimension_semantics<parallel>, #tpu.dimension_semantics<arbitrary>], iteration_bounds = array<i64: 4, 1, 1>, scalar_prefetch = 0 : i64, scratch_operands = 1 : i64, tpu.core_type = #tpu.core_type<tc>, window_params = [{transform_indices = @transform_0, window_bounds = array<i64: 128, 128>}, {transform_indices = @transform_1, window_bounds = array<i64: 128, 128>}, {transform_indices = @transform_2, window_bounds = array<i64: 1, 128>}, {transform_indices = @transform_3, window_bounds = array<i64: 128, 128>}]} {
    %c0_i32 = arith.constant 0 : i32
    %0 = arith.cmpi eq, %arg2, %c0_i32 : i32
    %1 = arith.extui %0 : i1 to i32
    %c0_i32_0 = arith.constant 0 : i32
    %2 = arith.cmpi ne, %1, %c0_i32_0 : i32
    scf.if %2 {
      %cst_10 = arith.constant 0.000000e+00 : f32
      %12 = vector.broadcast %cst_10 : f32 to vector<128x128xf32>
      %c0_11 = arith.constant 0 : index
      %c0_12 = arith.constant 0 : index
      %13 = vector.load %arg7[%c0_11, %c0_12] : memref<128x128xf32, #tpu.memory_space<vmem>>, vector<128x128xf32>
      tpu.vector_store %arg7[%c0_11, %c0_12], %12 {strides = array<i32>} : memref<128x128xf32, #tpu.memory_space<vmem>>, vector<128x128xf32>,
    } else {
    }
    %c0 = arith.constant 0 : index
    %c0_1 = arith.constant 0 : index
    %3 = vector.load %arg7[%c0, %c0_1] : memref<128x128xf32, #tpu.memory_space<vmem>>, vector<128x128xf32>
    %c0_2 = arith.constant 0 : index
    %c0_3 = arith.constant 0 : index
    %4 = vector.load %arg3[%c0_2, %c0_3] : memref<128x128xbf16, #tpu.memory_space<vmem>>, vector<128x128xbf16>
    %c0_4 = arith.constant 0 : index
    %c0_5 = arith.constant 0 : index
    %5 = vector.load %arg4[%c0_4, %c0_5] : memref<128x128xbf16, #tpu.memory_space<vmem>>, vector<128x128xbf16>
    %cst = arith.constant dense<0.000000e+00> : vector<128x128xf32>
    %6 = tpu.matmul %4, %5, %cst {dimension_numbers = #tpu.dot_dimension_numbers<[1], [0], [0], [1], [0, 0, 1, 1], [], []>} : vector<128x128xbf16>, vector<128x128xbf16>, vector<128x128xf32> -> vector<128x128xf32>
    %7 = arith.addf %3, %6 : vector<128x128xf32>
    %c0_6 = arith.constant 0 : index
    %c0_7 = arith.constant 0 : index
    %8 = vector.load %arg7[%c0_6, %c0_7] : memref<128x128xf32, #tpu.memory_space<vmem>>, vector<128x128xf32>
    tpu.vector_store %arg7[%c0_6, %c0_7], %7 {strides = array<i32>} : memref<128x128xf32, #tpu.memory_space<vmem>>, vector<128x128xf32>,
    %c0_i32_8 = arith.constant 0 : i32
    %9 = arith.cmpi eq, %arg2, %c0_i32_8 : i32
    %10 = arith.extui %9 : i1 to i32
    %c0_i32_9 = arith.constant 0 : i32
    %11 = arith.cmpi ne, %10, %c0_i32_9 : i32
    scf.if %11 {
      %c0_10 = arith.constant 0 : index
      %c0_11 = arith.constant 0 : index
      %12 = vector.load %arg7[%c0_10, %c0_11] : memref<128x128xf32, #tpu.memory_space<vmem>>, vector<128x128xf32>
      %c0_12 = arith.constant 0 : index
      %c0_13 = arith.constant 0 : index
      %13 = vector.load %arg5[%c0_12, %c0_13] : memref<1x128xf32, #tpu.memory_space<vmem>>, vector<1x128xf32>
      %14 = vector.broadcast %13 : vector<1x128xf32> to vector<128x128xf32>
      %15 = arith.addf %12, %14 : vector<128x128xf32>
      %c0_14 = arith.constant 0 : index
      %c0_15 = arith.constant 0 : index
      %16 = vector.load %arg6[%c0_14, %c0_15] : memref<128x128xf32, #tpu.memory_space<vmem>>, vector<128x128xf32>
      tpu.vector_store %arg6[%c0_14, %c0_15], %15 {strides = array<i32>} : memref<128x128xf32, #tpu.memory_space<vmem>>, vector<128x128xf32>,
    } else {
    }
    return
  }
  func.func @transform_0(%arg0: i32, %arg1: i32, %arg2: i32) -> (i32, i32) {
    %c0_i32 = arith.constant 0 : i32
    return %arg0, %arg2 : i32, i32
  }
  func.func @transform_1(%arg0: i32, %arg1: i32, %arg2: i32) -> (i32, i32) {
    %c0_i32 = arith.constant 0 : i32
    return %arg2, %arg1 : i32, i32
  }
  func.func @transform_2(%arg0: i32, %arg1: i32, %arg2: i32) -> (i32, i32) {
    %c0_i32 = arith.constant 0 : i32
    %c0_i32_0 = arith.constant 0 : i32
    return %c0_i32, %arg1 : i32, i32
  }
  func.func @transform_3(%arg0: i32, %arg1: i32, %arg2: i32) -> (i32, i32) {
    %c0_i32 = arith.constant 0 : i32
    return %arg0, %arg1 : i32, i32
  }
}

</mosaic_0001>

<bundles_post_ra>
// kernel: tpu_custom_call.1
= control target key start
LH: loop header
LB: loop body
LE: loop exit
PB: predicated region body
PF: predicated region fallthrough
CT: control target
= control target key end

     0   :  { %8 = vsyncpa [#allocation4], 0  ;;  %s1316_s0 = inlined_call_operand.hbm [shape: bf16[512,128], index: 0, kind: input, shape index: {}]   ;;  %s1317_s1 = inlined_call_operand.hbm [shape: bf16[128,128], index: 1, kind: input, shape index: {}]   ;;  %s1318_s2 = inlined_call_operand.vmem [shape: f32[1,128], index: 2, kind: input, shape index: {}]   ;;  %s1319_s3 = inlined_call_operand.hbm [shape: f32[512,128], index: 3, kind: output, shape index: {}]  }
   0x1   :  { %10 = vsyncpa [#allocation4 + $0x1], 0 }
   0x2   :  { %11 = vsyncpa [#allocation7], 0 }
   0x3   :  { %12 = vsyncpa [#allocation5], 0 }
   0x4   :  { %14 = vsyncpa [#allocation5 + $0x1], 0  ;;  %s1098_s12 = smov 0   ;;  %s1100_s13 = smov 0  }
   0x5   :  { %s1102_s14 = smov 0   ;;  %s1104_s15 = smov 0  }
   0x6   :  { %s1106_s16 = smov 0   ;;  %s1108_s17 = smov 0  }
   0x7 LB: > { %s737_s18 = sadd.s32 4294967295, %s1069_s17   ;;  %s738_s19 = sadd.s32 4294967294, %s1069_s17   ;;  %s1069_s17 = sphi %s1108_s17, %s20_s17   ;;  %s1065_s16 = sphi %s1106_s16, %s1340_s16   ;;  %s1061_s15 = sphi %s1104_s15, %s1339_s15   ;;  %s1057_s14 = sphi %s1102_s14, %s1338_s14   ;;  %s1053_s13 = sphi %s1100_s13, %s1337_s13   ;;  %s1049_s12 = sphi %s1098_s12, %s1336_s12  }
   0x8   : > { %p61_p0 = scmp.ne.s32.totalorder %s1053_s13, %s1049_s12  ;;  %p1132_p1 = scmp.eq.s32.totalorder %s737_s18, 0 }
   0x9   : > { %p1136_p2 = scmp.eq.s32.totalorder %s737_s18, 3  ;;  %p147_p3 = scmp.eq.s32.totalorder %s738_s19, 3 }
   0xa   : > { %p1142_p4 = por %p1132_p1, %p61_p0  ;;  %p739_p5 = scmp.ge.s32.totalorder %s1069_s17, 1 }
   0xb   : > { %p1147_p6 = por %p147_p3, %p61_p0  ;;  %p154_p7 = scmp.lt.s32.totalorder %s1069_s17, 5 }
   0xc   : > { %s1071_s25 = smov [#allocation6]   ;;  %s39_s28 = sadd.s32 1, %s1065_s16 }
   0xd   : > { %s1326_s23 = scalar_select %p1147_p6, 1, 0 }
   0xe   : > { %p1152_p8 = pnand %p739_p5, %p154_p7  ;;  %s170_s26 = sshll.u32 %s1071_s25, 4  ;;  %s171_s26 = int_to_ptr.vmem [resolvable:$true] %s170_s26 }
   0xf   : > { %s942_s29 = scalar_lea.vmem %s171_s26, 1024  ;;  %p950_p3 = scmp.lt.s32.totalorder %s171_s26, %s171_s26 }
  0x10   : > { %p846_p9 = pneg %p1152_p8  ;;  %p943_p12 = scmp.ne.s32.totalorder %s171_s26, %s942_s29 }
  0x11   : > { %p951_p5 = scmp.lt.s32.totalorder %s942_s29, %s942_s29 }
  0x12   : > { %p1160_p10 = pnand %p846_p9, %p1132_p1 }
  0x13   : > { %p952_p7 = por %p951_p5, %p950_p3 }
  0x14   : > { %p933_p11 = pneg %p1160_p10 }
  0x16   : > { %p945_p13 = pnand %p943_p12, %p933_p11 }
  0x18   : > { %p946_p0 = pneg %p945_p13 }
  0x1a   : > { %p953_p6 = pnand %p952_p7, %p946_p0 }
  0x1c   : > { %956 = shalt.err (!%p953_p6)
}
  0x1d   : > { %s1320_s30 = smov 64   ;;  %s1321_s4 = smov 4  }
  0x1e   : > { %849 = dma.hbm_to_vmem [thread:$0]  (!%p1160_p10), %s1317_s1, 1024, %s171_s26, [#allocation7], %s1320_s30, %s1320_s30, %s1321_s4  }
  0x1f   : > { %p41_p6 = scmp.ge.s32.totalorder %s39_s28, 4  ;;  %s48_s7 = sadd.s32 1, %s1057_s14 }
  0x20   : > { %p55_p9 = scmp.ne.s32.totalorder %s1057_s14, %s1053_s13  ;;  %p56_p11 = scmp.eq.s32.totalorder %s1069_s17, 0 }
  0x21   : > { %s1342_s28 = smov (%p41_p6, %s39_s28), 0  ;;  %p859_p0 = scmp.lt.s32.totalorder %s1069_s17, 4 }
  0x22   : > { %p1181_p12 = por %p56_p11, %p55_p9  ;;  %p1187_p13 = por %p1136_p2, %p55_p9 }
  0x23   : > { %s43_s10 = ssub.s32 %s1065_s16, %s1342_s28  ;;  %s190_s11 = sand.u32 1, %s1057_s14  }
  0x24   : > { %s1330_s9 = scalar_select %p1187_p13, 1, 0 }
  0x25   : > { %p46_p10 = scmp.eq.s32.totalorder %s43_s10, 0  ;;  %s743_s18 = sshll.u32 %s190_s11, 6 }
  0x26   : > { %s772_s25 = sshll.u32 %s1065_s16, 10  ;;  %s194_s5 = scalar_lea.vmem [#allocation3], %s743_s18 }
  0x27   : > { %s1196_s19 = scalar_select %p46_p10, %s1057_s14, %s48_s7  }
  0x28   : > { %s201_s29 = scalar_lea.hbm %s1316_s0, %s772_s25  ;;  %s202_s6 = sshll.u32 %s194_s5, 4  ;;  %s203_s6 = int_to_ptr.vmem [resolvable:$true] %s202_s6 }
  0x29   : > { %p1204_p2 = pnand %p859_p0, %p1181_p12  ;;  %s191_s30 = scalar_lea.sflag [#allocation4], %s190_s11 }
  0x2a   : > { %s970_s10 = scalar_lea.vmem %s203_s6, 1024  ;;  %s1074_s7 = smov [#allocation3]  }
  0x2b   : > { %p959_p3 = pneg %p1204_p2  ;;  %p971_p5 = scmp.ne.s32.totalorder %s203_s6, %s970_s10 }
  0x2c   : > { %s975_s4 = sshll.u32 %s1074_s7, 4  ;;  %s976_s4 = int_to_ptr.vmem [resolvable:$false] %s975_s4 }
  0x2d   : > { %p973_p7 = pnand %p971_p5, %p959_p3  ;;  %s977_s25 = scalar_lea.vmem %s976_s4, 2048 }
  0x2e   : > { %p978_p9 = scmp.lt.s32.totalorder %s203_s6, %s976_s4  ;;  %p979_p11 = scmp.lt.s32.totalorder %s977_s25, %s970_s10 }
  0x2f   : > { %p974_p6 = pneg %p973_p7 }
  0x30   : > { %p980_p10 = por %p979_p11, %p978_p9 }
  0x32   : > { %p981_p13 = pnand %p980_p10, %p974_p6 }
  0x34   : > { %984 = shalt.err (!%p981_p13)
}
  0x35   : > { %s1332_s8 = smov 4   ;;  %s1333_s18 = smov 64  }
  0x36   : > { %853 = dma.hbm_to_vmem [thread:$0]  (!%p1204_p2), %s201_s29, 1024, %s203_s6, %s191_s30, %s1333_s18, %s1333_s18, %s1332_s8  }
  0x37   : > { %214 = sbr.rel (%p1152_p8) target bundleno = 319 (0x13f), region = 32  ;;  %s1218_s11 = sand.u32 (!%p1152_p8), 1, %s1053_s13  }
  0x38   : > { %s747_s4 = sshll.u32 (!%p1152_p8), %s1218_s11, 6  ;;  %s217_s26 = scalar_lea.sflag (!%p1152_p8), [#allocation4], %s1218_s11 }
  0x39   : > { %s1222_s27 = scalar_lea.vmem (!%p1152_p8), [#allocation3], %s747_s4 }
  0x3c   : > { %1036 = dma.done.wait (%p1142_p4), %s217_s26, 1024  }
  0x3d   : > { %1038 = vsyncadd (%p1142_p4), %s217_s26, 4294966272 }
  0x3e   : > { %1040 = dma.done.wait (%p1132_p1), [#allocation7], 1024  }
  0x3f   : > { %1042 = vsyncadd (%p1132_p1), [#allocation7], 4294966272  ;;  %v915_v0 = vld [vmem:[#allocation6 + $0x38] sm:$0xff]   ;;  %v916_v1 = vld [vmem:[#allocation6 + $0x30] sm:$0xff]   ;;  %s749_s20 = sshll.u32 %s1218_s11, 7  ;;  %s773_s29 = sshll.u32 %s1061_s15, 11 }
  0x40   : > { %790 = vmatprep.subr.bf16.mxu0 %v915_v0  ;;  %822 = vmatprep.subr.bf16.mxu1 %v915_v0  ;;  %v917_v2 = vld [vmem:[#allocation6 + $0x28] sm:$0xff]   ;;  %v918_v3 = vld [vmem:[#allocation6 + $0x20] sm:$0xff]   ;;  %v919_v6 = vld [vmem:[#allocation6 + $0x18] sm:$0xff]   ;;  %s1244_s30 = scalar_lea.vmem [#allocation8], %s749_s20  ;;  %s1263_s10 = scalar_lea.hbm %s1319_s3, %s773_s29 }
  0x41   : > { %791 = vmatpush3.bf16.msra.mxu0 %v915_v0  ;;  %830 = vmatpush3.bf16.msra.mxu1 %v915_v0  ;;  %v923_v4 = vld [vmem:[%s1222_s27] sm:$0xff]   ;;  %v920_v7 = vld [vmem:[#allocation6 + $0x10] sm:$0xff]   ;;  %v921_v8 = vld [vmem:[#allocation6 + $0x8] sm:$0xff]   ;;  %s623_s5 = sshll.u32 %s1244_s30, 4  ;;  %s609_s15 = scalar_lea.sflag [#allocation5], %s1218_s11  ;;  %s1265_s5 = int_to_ptr.vmem [resolvable:$true] %s623_s5 }
  0x42   : > { %792 = vmatprep.subr.bf16.mxu0 %v916_v1  ;;  %823 = vmatprep.subr.bf16.mxu1 %v916_v1  ;;  %v924_v5 = vld [vmem:[%s1222_s27 + $0x20] sm:$0xff]   ;;  %v925_v10 = vld [vmem:[%s1222_s27 + $0x8] sm:$0xff]   ;;  %v927_v12 = vld [vmem:[%s1222_s27 + $0x10] sm:$0xff]   ;;  %s985_s7 = scalar_lea.vmem %s1265_s5, 2048  ;;  %p1334_p4 = scmp.ne.s32.totalorder %s1330_s9, 0 }
  0x43   : > { %806 = vmatprep.mubr.bf16.mxu0 %v923_v4  ;;  %814 = vmatprep.mubr.bf16.mxu1 %v924_v5  ;;  %v922_v9 = vld [vmem:[#allocation6] sm:$0xff]   ;;  %v926_v11 = vld [vmem:[%s1222_s27 + $0x28] sm:$0xff]   ;;  %v928_v13 = vld [vmem:[%s1222_s27 + $0x30] sm:$0xff]   ;;  %p986_p1 = scmp.ne.s32.totalorder %s1265_s5, %s985_s7  ;;  %s1075_s25 = smov [#allocation8]  }
  0x44   : > { %v929_v14 = vld [vmem:[%s1222_s27 + $0x18] sm:$0xff]   ;;  %v766_v16 = vld [vmem:[%s1318_s2] ss:$0 sm:$0xff]  ;;  %s989_s8 = sshll.u32 %s1075_s25, 4  ;;  %s990_s8 = int_to_ptr.vmem [resolvable:$false] %s989_s8 }
  0x45   : > { %793 = vmatpush3.bf16.msra.mxu0 %v916_v1  ;;  %831 = vmatpush3.bf16.msra.mxu1 %v916_v1  ;;  %v930_v15 = vld [vmem:[%s1222_s27 + $0x38] sm:$0xff]   ;;  %p987_p8 = pnand %p986_p1, %p1334_p4  ;;  %s991_s18 = scalar_lea.vmem %s990_s8, 4096 }
  0x46   : > { %794 = vmatprep.subr.bf16.mxu0 %v917_v2  ;;  %824 = vmatprep.subr.bf16.mxu1 %v917_v2  ;;  %p992_p13 = scmp.lt.s32.totalorder %s1265_s5, %s990_s8  ;;  %p993_p0 = scmp.lt.s32.totalorder %s991_s18, %s985_s7 }
  0x47   : > { %p988_p12 = pneg %p987_p8 }
  0x48   : > { %p994_p2 = por %p993_p0, %p992_p13 }
  0x49   : > { %795 = vmatpush3.bf16.msra.mxu0 %v917_v2  ;;  %832 = vmatpush3.bf16.msra.mxu1 %v917_v2 }
  0x4a   : > { %796 = vmatprep.subr.bf16.mxu0 %v918_v3  ;;  %825 = vmatprep.subr.bf16.mxu1 %v918_v3  ;;  %p995_p3 = pnand %p994_p2, %p988_p12 }
  0x4d   : > { %797 = vmatpush3.bf16.msra.mxu0 %v918_v3  ;;  %833 = vmatpush3.bf16.msra.mxu1 %v918_v3 }
  0x4e   : > { %798 = vmatprep.subr.bf16.mxu0 %v919_v6  ;;  %826 = vmatprep.subr.bf16.mxu1 %v919_v6 }
  0x51   : > { %799 = vmatpush3.bf16.msra.mxu0 %v919_v6  ;;  %834 = vmatpush3.bf16.msra.mxu1 %v919_v6 }
  0x52   : > { %800 = vmatprep.subr.bf16.mxu0 %v920_v7  ;;  %827 = vmatprep.subr.bf16.mxu1 %v920_v7 }
  0x55   : > { %801 = vmatpush3.bf16.msra.mxu0 %v920_v7  ;;  %835 = vmatpush3.bf16.msra.mxu1 %v920_v7 }
  0x56   : > { %802 = vmatprep.subr.bf16.mxu0 %v921_v8  ;;  %828 = vmatprep.subr.bf16.mxu1 %v921_v8 }
  0x59   : > { %803 = vmatpush3.bf16.msra.mxu0 %v921_v8  ;;  %836 = vmatpush3.bf16.msra.mxu1 %v921_v8 }
  0x5a   : > { %804 = vmatprep.subr.bf16.mxu0 %v922_v9  ;;  %829 = vmatprep.subr.bf16.mxu1 %v922_v9 }
  0x5d   : > { %805 = vmatpush3.bf16.msra.mxu0 %v922_v9  ;;  %837 = vmatpush3.bf16.msra.mxu1 %v922_v9 }
  0x60   : > { %807 = vmatmul.mubr.bf16.vlgmr.msra.gmra.mxu0 %v925_v10  ;;  %815 = vmatmul.mubr.bf16.vlgmr.msra.gmra.mxu1 %v926_v11 }
  0x61   : > { %810 = vmatprep.mubr.bf16.mxu0 %v927_v12  ;;  %818 = vmatprep.mubr.bf16.mxu1 %v928_v13 }
  0x68   : > { %811 = vmatmul.mubr.bf16.gmra.mxu0 %v929_v14  ;;  %819 = vmatmul.mubr.bf16.gmra.mxu1 %v930_v15 }
 0x120   : > { %v808_v17 = vpop.f32.mrf.mxu0  ;;  %v816_v18 = vpop.f32.mrf.mxu1 }
 0x121   : > { %v578_v19 = vadd.f32 %v808_v17, %v766_v16  ;;  %v586_v20 = vadd.f32 %v816_v18, %v766_v16 }
 0x122   : > { %v455_v21 = vpop.f32.mrf.mxu0  ;;  %v487_v22 = vpop.f32.mrf.mxu1 }
 0x123   : > { %594 = vst [vmem:[%s1244_s30 + $0x10] sm:$0xff] %v578_v19  ;;  %602 = vst [vmem:[%s1244_s30 + $0x50] sm:$0xff] %v586_v20  ;;  %v576_v23 = vadd.f32 %v766_v16, %v455_v21  ;;  %v584_v24 = vadd.f32 %v766_v16, %v487_v22 }
 0x124   : > { %v809_v25 = vpop.f32.mrf.mxu0  ;;  %v817_v26 = vpop.f32.mrf.mxu1 }
 0x125   : > { %592 = vst [vmem:[%s1244_s30] sm:$0xff] %v576_v23  ;;  %600 = vst [vmem:[%s1244_s30 + $0x40] sm:$0xff] %v584_v24  ;;  %v579_v27 = vadd.f32 %v809_v25, %v766_v16  ;;  %v587_v28 = vadd.f32 %v817_v26, %v766_v16 }
 0x126   : > { %v458_v29 = vpop.f32.mrf.mxu0  ;;  %v490_v30 = vpop.f32.mrf.mxu1 }
 0x127   : > { %595 = vst [vmem:[%s1244_s30 + $0x18] sm:$0xff] %v579_v27  ;;  %603 = vst [vmem:[%s1244_s30 + $0x58] sm:$0xff] %v587_v28  ;;  %v577_v31 = vadd.f32 %v766_v16, %v458_v29  ;;  %v585_v32 = vadd.f32 %v766_v16, %v490_v30 }
 0x128   : > { %v812_v33 = vpop.f32.mrf.mxu0  ;;  %v820_v34 = vpop.f32.mrf.mxu1 }
 0x129   : > { %593 = vst [vmem:[%s1244_s30 + $0x8] sm:$0xff] %v577_v31  ;;  %601 = vst [vmem:[%s1244_s30 + $0x48] sm:$0xff] %v585_v32  ;;  %v582_v35 = vadd.f32 %v812_v33, %v766_v16  ;;  %v590_v36 = vadd.f32 %v820_v34, %v766_v16 }
 0x12a   : > { %v471_v37 = vpop.f32.mrf.mxu0  ;;  %v503_v38 = vpop.f32.mrf.mxu1 }
 0x12b   : > { %598 = vst [vmem:[%s1244_s30 + $0x30] sm:$0xff] %v582_v35  ;;  %606 = vst [vmem:[%s1244_s30 + $0x70] sm:$0xff] %v590_v36  ;;  %v580_v39 = vadd.f32 %v766_v16, %v471_v37  ;;  %v588_v40 = vadd.f32 %v766_v16, %v503_v38 }
 0x12c   : > { %v813_v41 = vpop.f32.mrf.mxu0  ;;  %v821_v42 = vpop.f32.mrf.mxu1 }
 0x12d   : > { %596 = vst [vmem:[%s1244_s30 + $0x20] sm:$0xff] %v580_v39  ;;  %604 = vst [vmem:[%s1244_s30 + $0x60] sm:$0xff] %v588_v40  ;;  %v583_v43 = vadd.f32 %v813_v41, %v766_v16  ;;  %v591_v44 = vadd.f32 %v821_v42, %v766_v16 }
 0x12e   : > { %v474_v45 = vpop.f32.mrf.mxu0  ;;  %v506_v46 = vpop.f32.mrf.mxu1 }
 0x12f   : > { %599 = vst [vmem:[%s1244_s30 + $0x38] sm:$0xff] %v583_v43  ;;  %607 = vst [vmem:[%s1244_s30 + $0x78] sm:$0xff] %v591_v44  ;;  %v581_v47 = vadd.f32 %v766_v16, %v474_v45  ;;  %v589_v48 = vadd.f32 %v766_v16, %v506_v46 }
 0x131   : > { %597 = vst [vmem:[%s1244_s30 + $0x28] sm:$0xff] %v581_v47  ;;  %605 = vst [vmem:[%s1244_s30 + $0x68] sm:$0xff] %v589_v48 }
 0x132   : > { %998 = shalt.err (!%p995_p3)
}
 0x133   : > { %s999_s4 = scalar_lea.hbm %s1263_s10, 2048  ;;  %s1003_s20 = scalar_lea.hbm %s1319_s3, 8192 }
 0x134   : > { %p1000_p5 = scmp.ne.s32.totalorder %s1263_s10, %s999_s4  ;;  %p1004_p9 = scmp.lt.s32.totalorder %s1263_s10, %s1319_s3 }
 0x135   : > { %p1005_p11 = scmp.lt.s32.totalorder %s1003_s20, %s999_s4 }
 0x136   : > { %p1001_p7 = pnand %p1000_p5, %p1334_p4 }
 0x137   : > { %p1006_p10 = por %p1005_p11, %p1004_p9 }
 0x138   : > { %p1002_p6 = pneg %p1001_p7 }
 0x13a   : > { %p1007_p1 = pnand %p1006_p10, %p1002_p6 }
 0x13c   : > { %1010 = shalt.err (!%p1007_p1)
}
 0x13d   : > { %s1076_s30 = smov 128   ;;  %s1077_s29 = smov 8  }
 0x13e   : > { %844 = dma.vmem_to_hbm [thread:$0]  (%p1334_p4), %s1265_s5, 2048, %s1263_s10, %s609_s15, %s1076_s30, %s1076_s30, %s1077_s29  }
 0x13f PF: > { %p861_p8 = scmp.ge.s32.totalorder %s1069_s17, 2  ;;  %s638_s6 = sand.u32 1, %s1049_s12  }
 0x140   : > { %p1335_p12 = scmp.ne.s32.totalorder %s1326_s23, 0  ;;  %s639_s21 = scalar_lea.sflag [#allocation5], %s638_s6 }
 0x142   : > { %p855_p13 = pnand %p861_p8, %p1335_p12 }
 0x144   : > { %p856_p0 = pneg %p855_p13 }
 0x146   : > { %1044 = dma.done.wait (%p856_p0), %s639_s21, 2048  }
 0x147   : > { %1046 = vsyncadd (%p856_p0), %s639_s21, 4294965248  ;;  %s20_s17 = sadd.s32 1, %s1069_s17   ;;  %s1336_s12 = smov %s1053_s13 }
 0x148   : > { %p17_p2 = scmp.ge.s32.totalorder %s20_s17, 6   ;;  %s1337_s13 = smov %s1057_s14 }
 0x149   : > { %s1338_s14 = smov %s1196_s19  ;;  %s1339_s15 = smov %s1065_s16 }
 0x14a   : > { %s1340_s16 = smov %s1342_s28  ;;  %19 = sbr.rel (!%p17_p2) target bundleno = 7 (0x7), region = 93 }
 0x14f   :  { %644 = vsyncpa [#allocation4], 1 }
 0x150   :  { %646 = vsyncpa [#allocation4 + $0x1], 1 }
 0x151   :  { %647 = vsyncpa [#allocation7], 1 }
 0x152   :  { %648 = vsyncpa [#allocation5], 1 }
 0x153   :  { %650 = vsyncpa [#allocation5 + $0x1], 1 }

</bundles_post_ra>
